<compile_context>
chip_gen: v6e
topology: v6e:2x2x1
jax: 0.10.0
libtpu: 0.0.40
codegen_flags: <defaults>
</compile_context>

<pallas_src>
import jax
import jax.numpy as jnp
from jax.experimental import pallas as pl
from jax.experimental.pallas import tpu as pltpu

_LANE = 128
_TILE_BYTES = 4 * 1024 * 1024  # ~4 MiB per block (8192 f32 rows x 128 lanes)
_VMEM_LIMIT_BYTES = 32 * 1024 * 1024  # safe on v5e/v6e (128 MiB) and v7x (64 MiB/TC)


def _preprocess_kernel(x_ref, o_ref):
    # Pure elementwise VPU pass; compute in f32, cast to the output dtype.
    x = x_ref[...].astype(jnp.float32)
    o_ref[...] = (x / 1.9 - 127.0).astype(o_ref.dtype)


def _grid_semantics():
    # CORE_PARALLEL actually shards the grid across TensorCores (only matters
    # on multi-TC v7x); keep the inert-but-safe "parallel" everywhere else.
    kind = ""
    try:
        kind = jax.devices()[0].device_kind.lower()
    except Exception:
        pass
    if "v7" in kind:
        return (pltpu.CORE_PARALLEL,)
    return ("parallel",)


def preprocessing_layer(x: jax.Array) -> jax.Array:
    """Pallas equivalent of PreprocessingLayer.forward: x / 1.9 - 127."""
    orig_shape = x.shape
    n = x.size

    # torch promotes integer/bool inputs to float; float dtypes stay as-is.
    if jnp.issubdtype(x.dtype, jnp.floating):
        out_dtype = x.dtype
    else:
        out_dtype = jnp.float32

    in_itemsize = jnp.dtype(x.dtype).itemsize
    out_itemsize = jnp.dtype(out_dtype).itemsize
    itemsize = max(in_itemsize, out_itemsize)

    # ---- lane-dense (rows, 128) slab -------------------------------------
    flat = x.reshape(-1)
    pad = (-n) % _LANE  # usually 0 for NCHW image shapes
    if pad:
        flat = jnp.pad(flat, (0, pad))
    rows = (n + pad) // _LANE
    x2d = flat.reshape(rows, _LANE)

    # ---- block selection ---------------------------------------------------
    # ~4 MiB blocks; if the whole slab is smaller, take it in one full-extent
    # block. tile_rows is a multiple of 8, so every non-edge block is exact
    # (8,128) vreg tiles; the partial tail block is masked by Pallas.
    max_tile_rows = max(8, _TILE_BYTES // (_LANE * itemsize))
    tile_rows = rows if rows <= max_tile_rows else max_tile_rows
    grid = (pl.cdiv(rows, tile_rows),)

    # Same shape/dtype in and out -> let XLA reuse the HBM buffer when possible.
    aliases = {0: 0} if x2d.dtype == jnp.dtype(out_dtype) else {}

    out2d = pl.pallas_call(
        _preprocess_kernel,
        out_shape=jax.ShapeDtypeStruct((rows, _LANE), out_dtype),
        grid=grid,
        in_specs=[pl.BlockSpec((tile_rows, _LANE), lambda i: (i, 0))],
        out_specs=pl.BlockSpec((tile_rows, _LANE), lambda i: (i, 0)),
        compiler_params=pltpu.CompilerParams(
            dimension_semantics=_grid_semantics(),
            vmem_limit_bytes=_VMEM_LIMIT_BYTES,
        ),
        cost_estimate=pl.CostEstimate(
            flops=2 * n,
            transcendentals=0,
            bytes_accessed=n * (in_itemsize + out_itemsize),
        ),
        input_output_aliases=aliases,
    )(x2d)

    out_flat = out2d.reshape(-1)
    if pad:
        out_flat = out_flat[:n]
    return out_flat.reshape(orig_shape)


if __name__ == "__main__":
    key = jax.random.PRNGKey(0)
    # Small NCHW input consistent with an image-preprocessing layer.
    x = jax.random.uniform(
        key, (2, 4, 16, 16), dtype=jnp.float32, minval=0.0, maxval=255.0
    )

    out = jax.block_until_ready(preprocessing_layer(x))

    # Reference (same semantics as the PyTorch module).
    ref = x / 1.9 - 127
    assert out.shape == x.shape
    assert out.dtype == ref.dtype
    # Tolerance reflects f32 ULPs at |x/1.9| ~ 1e2 (Mosaic divide vs XLA divide
    # may differ by a couple of ULPs); still verifies ~5 significant digits.
    max_err = float(jnp.max(jnp.abs(out - ref)))
    assert jnp.allclose(out, ref, atol=1e-3, rtol=1e-4), max_err

    print("KERNEL_OK")
</pallas_src>

<mosaic_0001>
module attributes {stable_mosaic.version = 11 : i64} {
  func.func @_preprocess_kernel(%arg0: i32, %arg1: memref<16x128xf32, #tpu.memory_space<vmem>>, %arg2: memref<16x128xf32, #tpu.memory_space<vmem>>) attributes {dimension_semantics = [#tpu.dimension_semantics<parallel>], iteration_bounds = array<i64: 1>, scalar_prefetch = 0 : i64, scratch_operands = 0 : i64, tpu.core_type = #tpu.core_type<tc>, window_params = [{transform_indices = @transform_0, window_bounds = array<i64: 16, 128>}, {transform_indices = @transform_1, window_bounds = array<i64: 16, 128>}]} {
    %c0 = arith.constant 0 : index
    %c0_0 = arith.constant 0 : index
    %0 = vector.load %arg1[%c0, %c0_0] : memref<16x128xf32, #tpu.memory_space<vmem>>, vector<16x128xf32>
    %cst = arith.constant 1.900000e+00 : f32
    %1 = vector.broadcast %cst : f32 to vector<16x128xf32>
    %2 = arith.divf %0, %1 : vector<16x128xf32>
    %cst_1 = arith.constant 1.270000e+02 : f32
    %3 = vector.broadcast %cst_1 : f32 to vector<16x128xf32>
    %4 = arith.subf %2, %3 : vector<16x128xf32>
    %c0_2 = arith.constant 0 : index
    %c0_3 = arith.constant 0 : index
    %5 = vector.load %arg2[%c0_2, %c0_3] : memref<16x128xf32, #tpu.memory_space<vmem>>, vector<16x128xf32>
    tpu.vector_store %arg2[%c0_2, %c0_3], %4 {strides = array<i32>} : memref<16x128xf32, #tpu.memory_space<vmem>>, vector<16x128xf32>,
    return
  }
  func.func @transform_0(%arg0: i32) -> (i32, i32) {
    %c0_i32 = arith.constant 0 : i32
    %c0_i32_0 = arith.constant 0 : i32
    return %arg0, %c0_i32 : i32, i32
  }
  func.func @transform_1(%arg0: i32) -> (i32, i32) {
    %c0_i32 = arith.constant 0 : i32
    %c0_i32_0 = arith.constant 0 : i32
    return %arg0, %c0_i32 : i32, i32
  }
}

</mosaic_0001>

<bundles_post_ra>
// kernel: tpu_custom_call.1
= control target key start
LH: loop header
LB: loop body
LE: loop exit
PB: predicated region body
PF: predicated region fallthrough
CT: control target
= control target key end

     0   :  { %6 = vsyncpa [#allocation3], 0  ;;  %s119_s0 = inlined_call_operand.hbm [shape: f32[16,128], index: 0, kind: input, shape index: {}, may-alias: {0,1}]   ;;  %s120_s1 = inlined_call_operand.hbm [shape: f32[16,128], index: 1, kind: output, shape index: {}, may-alias: {0,1}]  }
   0x1   :  { %7 = vsyncpa [#allocation4], 0  ;;  %s99_s6 = smov [#allocation2]  }
   0x2   :  { %s13_s7 = sshll.u32 %s99_s6, 4  ;;  %s14_s7 = int_to_ptr.vmem [resolvable:$true] %s13_s7 }
   0x3   :  { %s63_s8 = scalar_lea.vmem %s14_s7, 256  ;;  %p68_p1 = scmp.lt.s32.totalorder %s14_s7, %s14_s7 }
   0x4   :  { %p64_p0 = scmp.ne.s32.totalorder %s14_s7, %s63_s8  ;;  %p69_p2 = scmp.lt.s32.totalorder %s63_s8, %s63_s8 }
   0x6   :  { %p70_p3 = por %p69_p2, %p68_p1 }
   0x8   :  { %p71_p4 = pnand %p70_p3, %p64_p0 }
   0xa   :  { %74 = shalt.err (!%p71_p4)
}
   0xb   :  { %s100_s9 = smov 128   ;;  %s101_s10 = smov 8  }
   0xc   :  { %19 = dma.hbm_to_vmem [thread:$0]  %s119_s0, 256, %s14_s7, [#allocation3], %s100_s9, %s100_s9, %s101_s10  }
   0xd   :  { %95 = dma.done.wait [#allocation3], 256  }
   0xe   :  { %96 = vsyncadd [#allocation3], 4294967040  ;;  %v23_v0 = vld [vmem:[#allocation2] sm:$0xff]  ;;  %v24_v1 = vld [vmem:[#allocation2 + $0x8] sm:$0xff]  ;;  %s102_s13 = smov [#allocation5]  }
   0xf   :  { %s37_s14 = sshll.u32 %s102_s13, 4  ;;  %v26_v2 = vmul.f32 0.5263158, %v23_v0  ;;  %v27_v3 = vmul.f32 0.5263158, %v24_v1  ;;  %s38_s14 = int_to_ptr.vmem [resolvable:$true] %s37_s14 }
  0x10   :  { %s75_s15 = scalar_lea.vmem %s38_s14, 256  ;;  %p80_p6 = scmp.lt.s32.totalorder %s38_s14, %s38_s14 }
  0x11   :  { %v49_v4 = vadd.f32 -127.0, %v26_v2  ;;  %v50_v5 = vadd.f32 -127.0, %v27_v3  ;;  %p76_p5 = scmp.ne.s32.totalorder %s38_s14, %s75_s15  ;;  %p81_p7 = scmp.lt.s32.totalorder %s75_s15, %s75_s15 }
  0x13   :  { %30 = vst [vmem:[#allocation5] sm:$0xff] %v49_v4  ;;  %31 = vst [vmem:[#allocation5 + $0x8] sm:$0xff] %v50_v5  ;;  %p82_p8 = por %p81_p7, %p80_p6 }
  0x15   :  { %p83_p9 = pnand %p82_p8, %p76_p5 }
  0x17   :  { %86 = shalt.err (!%p83_p9)
}
  0x18   :  { %43 = dma.vmem_to_hbm [thread:$0]  %s38_s14, 256, %s120_s1, [#allocation4], %s100_s9, %s100_s9, %s101_s10  }
  0x19   :  { %97 = dma.done.wait [#allocation4], 256  }
  0x1a   :  { %98 = vsyncadd [#allocation4], 4294967040 }
  0x1b   :  { %47 = vsyncpa [#allocation3], 1 }
  0x1c   :  { %48 = vsyncpa [#allocation4], 1 }

</bundles_post_ra>
